<compile_context>
chip_gen: v6e
topology: v6e:2x2x1
jax: 0.10.0
libtpu: 0.0.40
codegen_flags: <defaults>
</compile_context>

<pallas_src>
import functools
import math

import jax
import jax.numpy as jnp
from jax.experimental import pallas as pl
from jax.experimental.pallas import tpu as pltpu

LN_EPS = 1e-5  # PyTorch nn.LayerNorm default


def _layer_norm(x, gamma, beta):
    mean = jnp.mean(x, axis=-1, keepdims=True)
    var = jnp.mean((x - mean) ** 2, axis=-1, keepdims=True)
    inv = jax.lax.rsqrt(var + LN_EPS)
    return (x - mean) * inv * gamma + beta


def fused_encoder_kernel(q_ref, k_ref, v_ref, mask_ref,
                         wq_ref, wk_ref, wv_ref, wd_ref,
                         g1_ref, be1_ref, g2_ref, be2_ref,
                         w1_ref, b1_ref, w2_ref, b2_ref,
                         o_ref, *, n_heads, bblk, seq):
    # grid = (batch_blocks, n_layers); layer axis is last / "arbitrary".
    l = pl.program_id(1)

    BT, D = o_ref.shape
    hd = D // n_heads
    inv_scale = jnp.float32(1.0 / math.sqrt(hd))

    # o_ref doubles as the layer-to-layer carry: its block index ignores l, so
    # Pallas keeps it VMEM-resident across the layer axis and only writes HBM
    # when the batch block changes.  First layer reads q instead.
    x = jnp.where(l == 0, q_ref[...], o_ref[...])       # (BT, D) f32 carry
    xb = x.astype(jnp.bfloat16)
    kb = k_ref[...]                                     # (BT, D) bf16
    vb = v_ref[...]                                     # (BT, D) bf16

    wq = wq_ref[0]                                      # (D, D) bf16
    wk = wk_ref[0]
    wv = wv_ref[0]
    wd = wd_ref[0]

    # QKV projections: one wide MXU dot each over the whole (B*T, D) slab,
    # bf16 operands / f32 accumulation.  1/sqrt(hd) folded into Q once; cast
    # back to bf16 once so only bf16 copies stay live through the head loop.
    Q = (jnp.dot(xb, wq, preferred_element_type=jnp.float32)
         * inv_scale).astype(jnp.bfloat16)
    K = jnp.dot(kb, wk, preferred_element_type=jnp.float32).astype(jnp.bfloat16)
    V = jnp.dot(vb, wv, preferred_element_type=jnp.float32).astype(jnp.bfloat16)

    Qb = Q.reshape(bblk, seq, D)
    Kb = K.reshape(bblk, seq, D)
    Vb = V.reshape(bblk, seq, D)

    # Hoist the mask broadcast out of the (unrolled) head loop.
    mask_b = jnp.broadcast_to(mask_ref[...], (bblk, seq, seq))   # f32, additive

    # Attention: short static loop over heads with batched 3-D einsums (no
    # explicit K transpose).  Per-head contexts are concatenated into a
    # lane-dense (BT, D) buffer so the output projection is ONE full-K
    # (BT,D)x(D,D) MXU matmul instead of n_heads small-K (hd) matmuls.
    ctx_heads = []
    for h in range(n_heads):
        sl = slice(h * hd, (h + 1) * hd)
        Qh = Qb[:, :, sl]
        Kh = Kb[:, :, sl]
        Vh = Vb[:, :, sl]

        s = jnp.einsum("bqd,bkd->bqk", Qh, Kh,
                       preferred_element_type=jnp.float32)       # (bblk, T, T)
        s = s + mask_b
        s = s - jnp.max(s, axis=-1, keepdims=True)
        p = jnp.exp(s)
        p = p * pl.reciprocal(jnp.sum(p, axis=-1, keepdims=True), approx=True)

        zh = jnp.einsum("bqk,bkd->bqd", p.astype(jnp.bfloat16), Vh,
                        preferred_element_type=jnp.float32)      # (bblk, T, hd)
        ctx_heads.append(zh.astype(jnp.bfloat16))

    ctx = jnp.concatenate(ctx_heads, axis=-1).reshape(BT, D)     # (BT, D) bf16
    attn = jnp.dot(ctx, wd, preferred_element_type=jnp.float32)  # single full-K dot

    # Add & LayerNorm 1 (original order: LN(attn) + q), f32.
    x1 = _layer_norm(attn, g1_ref[0], be1_ref[0]) + x

    # Feed forward: bf16 dots / f32 accumulation; h1 kept bf16 after the ReLU
    # to halve the largest transient.
    h1 = jnp.dot(x1.astype(jnp.bfloat16), w1_ref[0],
                 preferred_element_type=jnp.float32) + b1_ref[0]
    h1 = jnp.maximum(h1, 0.0).astype(jnp.bfloat16)
    ff = jnp.dot(h1, w2_ref[0], preferred_element_type=jnp.float32) + b2_ref[0]

    # Add & LayerNorm 2 -> carry / output.  Single full-slab store per layer.
    o_ref[...] = _layer_norm(ff + x1, g2_ref[0], be2_ref[0])


def _default_batch_block(B):
    # v7x has 2 TensorCores/chip: split the batch so the "parallel" axis has
    # extent >= 2.  Single-core parts (v5e/v6e) keep the whole batch in one
    # block so per-layer weights are only DMA'd once.
    try:
        kind = jax.devices()[0].device_kind.lower()
        if "v7" in kind and B % 2 == 0:
            return B // 2
    except Exception:
        pass
    return B


def _vmem_limit_bytes(BT, T, D, H):
    bf16, f32 = 2, 4
    acts = BT * D * (f32 + 2 * bf16) + T * T * f32              # q + k + v + mask
    weights = (4 * D * D + 2 * D * H) * bf16 + (6 * D + H) * f32
    out = BT * D * f32
    transients = BT * (8 * D + 2 * H) * f32                     # rough upper bound
    demand = 2 * (acts + weights + out) + transients            # double buffering
    limit = max(int(1.5 * demand), 32 * 1024 * 1024)
    try:
        cap = pltpu.get_tpu_info().vmem_capacity_bytes
        limit = min(limit, int(0.75 * cap))                     # headroom (v7x: 64 MiB)
    except Exception:
        limit = min(limit, 48 * 1024 * 1024)
    return limit


def encoder_forward(q, k, v, mask, layer_params, n_heads, *, batch_block=None):
    """q, k, v: (B, T, D) f32; mask: (T, T) additive; returns (B, T, D) f32."""
    B, T, D = q.shape
    assert D % n_heads == 0
    L = len(layer_params)
    H = layer_params[0]["w1"].shape[-1]
    bblk = _default_batch_block(B) if batch_block is None else batch_block
    assert B % bblk == 0
    BT = bblk * T

    def stack(name, dtype=None):
        a = jnp.stack([p[name] for p in layer_params], axis=0)
        return a.astype(dtype) if dtype is not None else a

    # Matmul weights in bf16 (halves HBM/VMEM traffic, native MXU dtype);
    # LayerNorm params and biases stay f32.
    wq = stack("wq", jnp.bfloat16)
    wk = stack("wk", jnp.bfloat16)
    wv = stack("wv", jnp.bfloat16)
    wd = stack("wd", jnp.bfloat16)
    w1 = stack("w1", jnp.bfloat16)
    w2 = stack("w2", jnp.bfloat16)
    g1, be1 = stack("g1"), stack("be1")
    g2, be2 = stack("g2"), stack("be2")
    b1, b2 = stack("b1"), stack("b2")

    q2 = q.reshape(B * T, D).astype(jnp.float32)       # carried in f32
    k2 = k.reshape(B * T, D).astype(jnp.bfloat16)      # matmul-only operands
    v2 = v.reshape(B * T, D).astype(jnp.bfloat16)
    mask = mask.astype(jnp.float32)

    act_spec = pl.BlockSpec((BT, D), lambda b, l: (b, 0))

    def lspec(shape):
        return pl.BlockSpec((1,) + shape, lambda b, l: (l, 0, 0))

    kern = functools.partial(fused_encoder_kernel,
                             n_heads=n_heads, bblk=bblk, seq=T)

    out2 = pl.pallas_call(
        kern,
        out_shape=jax.ShapeDtypeStruct((B * T, D), jnp.float32),
        grid=(B // bblk, L),
        in_specs=[
            act_spec,                                   # q  (f32)
            act_spec,                                   # k  (bf16)
            act_spec,                                   # v  (bf16)
            pl.BlockSpec((T, T), lambda b, l: (0, 0)),  # mask (shared)
            lspec((D, D)), lspec((D, D)),               # wq, wk
            lspec((D, D)), lspec((D, D)),               # wv, wd
            lspec((1, D)), lspec((1, D)),               # ln1 gamma, beta
            lspec((1, D)), lspec((1, D)),               # ln2 gamma, beta
            lspec((D, H)), lspec((1, H)),               # ff w1, b1
            lspec((H, D)), lspec((1, D)),               # ff w2, b2
        ],
        out_specs=act_spec,
        compiler_params=pltpu.CompilerParams(
            dimension_semantics=("parallel", "arbitrary"),
            vmem_limit_bytes=_vmem_limit_bytes(BT, T, D, H),
        ),
    )(q2, k2, v2, mask, wq, wk, wv, wd, g1, be1, g2, be2, w1, b1, w2, b2)
    return out2.reshape(B, T, D)


# ----------------------------- pure-JAX reference -----------------------------
def ref_cell(x, k, v, mask, p, n_heads):
    B, T, D = x.shape
    hd = D // n_heads
    Q = (x @ p["wq"]).reshape(B, T, n_heads, hd).transpose(0, 2, 1, 3)
    K = (k @ p["wk"]).reshape(B, T, n_heads, hd).transpose(0, 2, 1, 3)
    V = (v @ p["wv"]).reshape(B, T, n_heads, hd).transpose(0, 2, 1, 3)
    s = jnp.einsum("bhqd,bhkd->bhqk", Q, K) / jnp.sqrt(jnp.float32(hd)) + mask
    a = jax.nn.softmax(s, axis=-1)
    z = jnp.einsum("bhqk,bhkd->bhqd", a, V).transpose(0, 2, 1, 3).reshape(B, T, D)
    attn = z @ p["wd"]
    x1 = _layer_norm(attn, p["g1"], p["be1"]) + x
    ff = jnp.maximum(x1 @ p["w1"] + p["b1"], 0.0) @ p["w2"] + p["b2"]
    return _layer_norm(ff + x1, p["g2"], p["be2"])


def ref_encoder(q, k, v, mask, layer_params, n_heads):
    x = q
    for p in layer_params:
        x = ref_cell(x, k, v, mask, p, n_heads)
    return x


# --------------------------------- init / main ---------------------------------
def init_layer_params(key, D, H):
    ks = jax.random.split(key, 8)
    s = 0.05
    return {
        "wq": s * jax.random.normal(ks[0], (D, D), jnp.float32),
        "wk": s * jax.random.normal(ks[1], (D, D), jnp.float32),
        "wv": s * jax.random.normal(ks[2], (D, D), jnp.float32),
        "wd": s * jax.random.normal(ks[3], (D, D), jnp.float32),
        "g1": jnp.ones((1, D), jnp.float32),
        "be1": jnp.zeros((1, D), jnp.float32),
        "g2": jnp.ones((1, D), jnp.float32),
        "be2": jnp.zeros((1, D), jnp.float32),
        "w1": s * jax.random.normal(ks[4], (D, H), jnp.float32),
        "b1": s * jax.random.normal(ks[5], (1, H), jnp.float32),
        "w2": s * jax.random.normal(ks[6], (H, D), jnp.float32),
        "b2": s * jax.random.normal(ks[7], (1, D), jnp.float32),
    }


if __name__ == "__main__":
    B, T, D, H = 2, 8, 32, 64      # batch, seq, input_size, hidden_size
    n_heads, n_layers = 2, 2

    root = jax.random.PRNGKey(0)
    kq, kk, kv, kp = jax.random.split(root, 4)
    q = jax.random.normal(kq, (B, T, D), jnp.float32)
    k = jax.random.normal(kk, (B, T, D), jnp.float32)
    v = jax.random.normal(kv, (B, T, D), jnp.float32)

    # additive causal mask, shared across batch & heads: 0 allowed, -1e9 masked
    causal = jnp.tril(jnp.ones((T, T), jnp.float32))
    mask = jnp.where(causal > 0, 0.0, -1e9)          # (T, T)

    layer_params = [init_layer_params(kk_, D, H)
                    for kk_ in jax.random.split(kp, n_layers)]

    out = encoder_forward(q, k, v, mask, layer_params, n_heads)
    out = jax.block_until_ready(out)

    ref = ref_encoder(q, k, v, mask, layer_params, n_heads)
    assert out.shape == (B, T, D)
    # bf16 matmul operands + approx softmax reciprocal in the kernel vs f32
    # reference -> looser tolerance.
    assert jnp.allclose(out, ref, atol=5e-2, rtol=5e-2), "mismatch vs JAX reference"

    print("KERNEL_OK")
</pallas_src>

<mosaic_0001>
module attributes {stable_mosaic.version = 11 : i64} {
  func.func @fused_encoder_kernel(%arg0: i32, %arg1: i32, %arg2: memref<16x32xf32, #tpu.memory_space<vmem>>, %arg3: memref<16x32xbf16, #tpu.memory_space<vmem>>, %arg4: memref<16x32xbf16, #tpu.memory_space<vmem>>, %arg5: memref<8x8xf32, #tpu.memory_space<vmem>>, %arg6: memref<1x32x32xbf16, #tpu.memory_space<vmem>>, %arg7: memref<1x32x32xbf16, #tpu.memory_space<vmem>>, %arg8: memref<1x32x32xbf16, #tpu.memory_space<vmem>>, %arg9: memref<1x32x32xbf16, #tpu.memory_space<vmem>>, %arg10: memref<1x1x32xf32, #tpu.memory_space<vmem>>, %arg11: memref<1x1x32xf32, #tpu.memory_space<vmem>>, %arg12: memref<1x1x32xf32, #tpu.memory_space<vmem>>, %arg13: memref<1x1x32xf32, #tpu.memory_space<vmem>>, %arg14: memref<1x32x64xbf16, #tpu.memory_space<vmem>>, %arg15: memref<1x1x64xf32, #tpu.memory_space<vmem>>, %arg16: memref<1x64x32xbf16, #tpu.memory_space<vmem>>, %arg17: memref<1x1x32xf32, #tpu.memory_space<vmem>>, %arg18: memref<16x32xf32, #tpu.memory_space<vmem>>) attributes {dimension_semantics = [#tpu.dimension_semantics<parallel>, #tpu.dimension_semantics<arbitrary>], iteration_bounds = array<i64: 1, 2>, scalar_prefetch = 0 : i64, scratch_operands = 0 : i64, tpu.core_type = #tpu.core_type<tc>, window_params = [{transform_indices = @transform_0, window_bounds = array<i64: 16, 32>}, {transform_indices = @transform_1, window_bounds = array<i64: 16, 32>}, {transform_indices = @transform_2, window_bounds = array<i64: 16, 32>}, {pipeline_mode = #tpu.pipeline_mode<synchronous>, transform_indices = @transform_3, window_bounds = array<i64: 8, 8>}, {transform_indices = @transform_4, window_bounds = array<i64: 1, 32, 32>}, {transform_indices = @transform_5, window_bounds = array<i64: 1, 32, 32>}, {transform_indices = @transform_6, window_bounds = array<i64: 1, 32, 32>}, {transform_indices = @transform_7, window_bounds = array<i64: 1, 32, 32>}, {transform_indices = @transform_8, window_bounds = array<i64: 1, 1, 32>}, {transform_indices = @transform_9, window_bounds = array<i64: 1, 1, 32>}, {transform_indices = @transform_10, window_bounds = array<i64: 1, 1, 32>}, {transform_indices = @transform_11, window_bounds = array<i64: 1, 1, 32>}, {transform_indices = @transform_12, window_bounds = array<i64: 1, 32, 64>}, {transform_indices = @transform_13, window_bounds = array<i64: 1, 1, 64>}, {transform_indices = @transform_14, window_bounds = array<i64: 1, 64, 32>}, {transform_indices = @transform_15, window_bounds = array<i64: 1, 1, 32>}, {transform_indices = @transform_16, window_bounds = array<i64: 16, 32>}]} {
    %c0_i32 = arith.constant 0 : i32
    %0 = arith.cmpi eq, %arg1, %c0_i32 : i32
    %c0 = arith.constant 0 : index
    %c0_0 = arith.constant 0 : index
    %1 = vector.load %arg2[%c0, %c0_0] : memref<16x32xf32, #tpu.memory_space<vmem>>, vector<16x32xf32>
    %c0_1 = arith.constant 0 : index
    %c0_2 = arith.constant 0 : index
    %2 = vector.load %arg18[%c0_1, %c0_2] : memref<16x32xf32, #tpu.memory_space<vmem>>, vector<16x32xf32>
    %3 = arith.select %0, %1, %2 : vector<16x32xf32>
    %4 = arith.truncf %3 : vector<16x32xf32> to vector<16x32xbf16>
    %c0_3 = arith.constant 0 : index
    %c0_4 = arith.constant 0 : index
    %5 = vector.load %arg3[%c0_3, %c0_4] : memref<16x32xbf16, #tpu.memory_space<vmem>>, vector<16x32xbf16>
    %c0_5 = arith.constant 0 : index
    %c0_6 = arith.constant 0 : index
    %6 = vector.load %arg4[%c0_5, %c0_6] : memref<16x32xbf16, #tpu.memory_space<vmem>>, vector<16x32xbf16>
    %c0_7 = arith.constant 0 : index
    %c0_8 = arith.constant 0 : index
    %c0_9 = arith.constant 0 : index
    %7 = vector.load %arg6[%c0_7, %c0_8, %c0_9] : memref<1x32x32xbf16, #tpu.memory_space<vmem>>, vector<1x32x32xbf16>
    %8 = vector.shape_cast %7 : vector<1x32x32xbf16> to vector<32x32xbf16>
    %c0_10 = arith.constant 0 : index
    %c0_11 = arith.constant 0 : index
    %c0_12 = arith.constant 0 : index
    %9 = vector.load %arg7[%c0_10, %c0_11, %c0_12] : memref<1x32x32xbf16, #tpu.memory_space<vmem>>, vector<1x32x32xbf16>
    %10 = vector.shape_cast %9 : vector<1x32x32xbf16> to vector<32x32xbf16>
    %c0_13 = arith.constant 0 : index
    %c0_14 = arith.constant 0 : index
    %c0_15 = arith.constant 0 : index
    %11 = vector.load %arg8[%c0_13, %c0_14, %c0_15] : memref<1x32x32xbf16, #tpu.memory_space<vmem>>, vector<1x32x32xbf16>
    %12 = vector.shape_cast %11 : vector<1x32x32xbf16> to vector<32x32xbf16>
    %c0_16 = arith.constant 0 : index
    %c0_17 = arith.constant 0 : index
    %c0_18 = arith.constant 0 : index
    %13 = vector.load %arg9[%c0_16, %c0_17, %c0_18] : memref<1x32x32xbf16, #tpu.memory_space<vmem>>, vector<1x32x32xbf16>
    %14 = vector.shape_cast %13 : vector<1x32x32xbf16> to vector<32x32xbf16>
    %cst = arith.constant dense<0.000000e+00> : vector<16x32xf32>
    %15 = tpu.matmul %4, %8, %cst {dimension_numbers = #tpu.dot_dimension_numbers<[1], [0], [0], [1], [0, 0, 1, 1], [], []>} : vector<16x32xbf16>, vector<32x32xbf16>, vector<16x32xf32> -> vector<16x32xf32>
    %cst_19 = arith.constant 2.500000e-01 : f32
    %16 = vector.broadcast %cst_19 : f32 to vector<16x32xf32>
    %17 = arith.mulf %15, %16 : vector<16x32xf32>
    %18 = arith.truncf %17 : vector<16x32xf32> to vector<16x32xbf16>
    %cst_20 = arith.constant dense<0.000000e+00> : vector<16x32xf32>
    %19 = tpu.matmul %5, %10, %cst_20 {dimension_numbers = #tpu.dot_dimension_numbers<[1], [0], [0], [1], [0, 0, 1, 1], [], []>} : vector<16x32xbf16>, vector<32x32xbf16>, vector<16x32xf32> -> vector<16x32xf32>
    %20 = arith.truncf %19 : vector<16x32xf32> to vector<16x32xbf16>
    %cst_21 = arith.constant dense<0.000000e+00> : vector<16x32xf32>
    %21 = tpu.matmul %6, %12, %cst_21 {dimension_numbers = #tpu.dot_dimension_numbers<[1], [0], [0], [1], [0, 0, 1, 1], [], []>} : vector<16x32xbf16>, vector<32x32xbf16>, vector<16x32xf32> -> vector<16x32xf32>
    %22 = arith.truncf %21 : vector<16x32xf32> to vector<16x32xbf16>
    %23 = vector.shape_cast %18 : vector<16x32xbf16> to vector<2x8x32xbf16>
    %24 = vector.shape_cast %20 : vector<16x32xbf16> to vector<2x8x32xbf16>
    %25 = vector.shape_cast %22 : vector<16x32xbf16> to vector<2x8x32xbf16>
    %c0_22 = arith.constant 0 : index
    %c0_23 = arith.constant 0 : index
    %26 = vector.load %arg5[%c0_22, %c0_23] : memref<8x8xf32, #tpu.memory_space<vmem>>, vector<8x8xf32>
    %27 = vector.shape_cast %26 : vector<8x8xf32> to vector<1x8x8xf32>
    %28 = vector.broadcast %27 : vector<1x8x8xf32> to vector<2x8x8xf32>
    %29 = vector.extract_strided_slice %23 {offsets = [0, 0, 0], sizes = [2, 8, 16], strides = [1, 1, 1]} : vector<2x8x32xbf16> to vector<2x8x16xbf16>
    %30 = vector.extract_strided_slice %24 {offsets = [0, 0, 0], sizes = [2, 8, 16], strides = [1, 1, 1]} : vector<2x8x32xbf16> to vector<2x8x16xbf16>
    %31 = vector.extract_strided_slice %25 {offsets = [0, 0, 0], sizes = [2, 8, 16], strides = [1, 1, 1]} : vector<2x8x32xbf16> to vector<2x8x16xbf16>
    "tpu.trace_start"() <{level = 10 : i32, message = "bqd,bkd->bqk"}> : () -> ()
    %cst_24 = arith.constant dense<0.000000e+00> : vector<2x8x8xf32>
    %32 = tpu.matmul %29, %30, %cst_24 {dimension_numbers = #tpu.dot_dimension_numbers<[2], [2], [1], [1], [0, 0, 0, 1, 1, 1], [0], [0]>} : vector<2x8x16xbf16>, vector<2x8x16xbf16>, vector<2x8x8xf32> -> vector<2x8x8xf32>
    "tpu.trace_stop"() : () -> ()
    %33 = arith.addf %32, %28 : vector<2x8x8xf32>
    %cst_25 = arith.constant dense<0xFF800000> : vector<2x8xf32>
    %34 = vector.multi_reduction <maximumf>, %33, %cst_25 [2] : vector<2x8x8xf32> to vector<2x8xf32>
    %35 = vector.shape_cast %34 : vector<2x8xf32> to vector<2x8x1xf32>
    %36 = vector.broadcast %35 : vector<2x8x1xf32> to vector<2x8x8xf32>
    %37 = arith.subf %33, %36 : vector<2x8x8xf32>
    %38 = math.exp %37 : vector<2x8x8xf32>
    %cst_26 = arith.constant dense<0.000000e+00> : vector<2x8xf32>
    %39 = vector.multi_reduction <add>, %38, %cst_26 [2] : vector<2x8x8xf32> to vector<2x8xf32>
    %40 = vector.shape_cast %39 : vector<2x8xf32> to vector<2x8x1xf32>
    %41 = tpu.reciprocal %40 {approx = true} : vector<2x8x1xf32> -> vector<2x8x1xf32>
    %42 = vector.broadcast %41 : vector<2x8x1xf32> to vector<2x8x8xf32>
    %43 = arith.mulf %38, %42 : vector<2x8x8xf32>
    %44 = arith.truncf %43 : vector<2x8x8xf32> to vector<2x8x8xbf16>
    "tpu.trace_start"() <{level = 10 : i32, message = "bqk,bkd->bqd"}> : () -> ()
    %cst_27 = arith.constant dense<0.000000e+00> : vector<2x8x16xf32>
    %45 = tpu.matmul %44, %31, %cst_27 {dimension_numbers = #tpu.dot_dimension_numbers<[2], [1], [1], [2], [0, 0, 0, 1, 1, 2], [0], [0]>} : vector<2x8x8xbf16>, vector<2x8x16xbf16>, vector<2x8x16xf32> -> vector<2x8x16xf32>
    "tpu.trace_stop"() : () -> ()
    %46 = arith.truncf %45 : vector<2x8x16xf32> to vector<2x8x16xbf16>
    %47 = vector.extract_strided_slice %23 {offsets = [0, 0, 16], sizes = [2, 8, 16], strides = [1, 1, 1]} : vector<2x8x32xbf16> to vector<2x8x16xbf16>
    %48 = vector.extract_strided_slice %24 {offsets = [0, 0, 16], sizes = [2, 8, 16], strides = [1, 1, 1]} : vector<2x8x32xbf16> to vector<2x8x16xbf16>
    %49 = vector.extract_strided_slice %25 {offsets = [0, 0, 16], sizes = [2, 8, 16], strides = [1, 1, 1]} : vector<2x8x32xbf16> to vector<2x8x16xbf16>
    "tpu.trace_start"() <{level = 10 : i32, message = "bqd,bkd->bqk"}> : () -> ()
    %cst_28 = arith.constant dense<0.000000e+00> : vector<2x8x8xf32>
    %50 = tpu.matmul %47, %48, %cst_28 {dimension_numbers = #tpu.dot_dimension_numbers<[2], [2], [1], [1], [0, 0, 0, 1, 1, 1], [0], [0]>} : vector<2x8x16xbf16>, vector<2x8x16xbf16>, vector<2x8x8xf32> -> vector<2x8x8xf32>
    "tpu.trace_stop"() : () -> ()
    %51 = arith.addf %50, %28 : vector<2x8x8xf32>
    %cst_29 = arith.constant dense<0xFF800000> : vector<2x8xf32>
    %52 = vector.multi_reduction <maximumf>, %51, %cst_29 [2] : vector<2x8x8xf32> to vector<2x8xf32>
    %53 = vector.shape_cast %52 : vector<2x8xf32> to vector<2x8x1xf32>
    %54 = vector.broadcast %53 : vector<2x8x1xf32> to vector<2x8x8xf32>
    %55 = arith.subf %51, %54 : vector<2x8x8xf32>
    %56 = math.exp %55 : vector<2x8x8xf32>
    %cst_30 = arith.constant dense<0.000000e+00> : vector<2x8xf32>
    %57 = vector.multi_reduction <add>, %56, %cst_30 [2] : vector<2x8x8xf32> to vector<2x8xf32>
    %58 = vector.shape_cast %57 : vector<2x8xf32> to vector<2x8x1xf32>
    %59 = tpu.reciprocal %58 {approx = true} : vector<2x8x1xf32> -> vector<2x8x1xf32>
    %60 = vector.broadcast %59 : vector<2x8x1xf32> to vector<2x8x8xf32>
    %61 = arith.mulf %56, %60 : vector<2x8x8xf32>
    %62 = arith.truncf %61 : vector<2x8x8xf32> to vector<2x8x8xbf16>
    "tpu.trace_start"() <{level = 10 : i32, message = "bqk,bkd->bqd"}> : () -> ()
    %cst_31 = arith.constant dense<0.000000e+00> : vector<2x8x16xf32>
    %63 = tpu.matmul %62, %49, %cst_31 {dimension_numbers = #tpu.dot_dimension_numbers<[2], [1], [1], [2], [0, 0, 0, 1, 1, 2], [0], [0]>} : vector<2x8x8xbf16>, vector<2x8x16xbf16>, vector<2x8x16xf32> -> vector<2x8x16xf32>
    "tpu.trace_stop"() : () -> ()
    %64 = arith.truncf %63 : vector<2x8x16xf32> to vector<2x8x16xbf16>
    %65 = tpu.concatenate %46, %64 in 2 : vector<2x8x16xbf16>, vector<2x8x16xbf16> -> vector<2x8x32xbf16>
    %66 = vector.shape_cast %65 : vector<2x8x32xbf16> to vector<16x32xbf16>
    %cst_32 = arith.constant dense<0.000000e+00> : vector<16x32xf32>
    %67 = tpu.matmul %66, %14, %cst_32 {dimension_numbers = #tpu.dot_dimension_numbers<[1], [0], [0], [1], [0, 0, 1, 1], [], []>} : vector<16x32xbf16>, vector<32x32xbf16>, vector<16x32xf32> -> vector<16x32xf32>
    %c0_33 = arith.constant 0 : index
    %c0_34 = arith.constant 0 : index
    %c0_35 = arith.constant 0 : index
    %68 = vector.load %arg10[%c0_33, %c0_34, %c0_35] : memref<1x1x32xf32, #tpu.memory_space<vmem>>, vector<1x1x32xf32>
    %69 = vector.shape_cast %68 : vector<1x1x32xf32> to vector<1x32xf32>
    %c0_36 = arith.constant 0 : index
    %c0_37 = arith.constant 0 : index
    %c0_38 = arith.constant 0 : index
    %70 = vector.load %arg11[%c0_36, %c0_37, %c0_38] : memref<1x1x32xf32, #tpu.memory_space<vmem>>, vector<1x1x32xf32>
    %71 = vector.shape_cast %70 : vector<1x1x32xf32> to vector<1x32xf32>
    %cst_39 = arith.constant dense<0.000000e+00> : vector<16xf32>
    %72 = vector.multi_reduction <add>, %67, %cst_39 [1] : vector<16x32xf32> to vector<16xf32>
    %73 = vector.shape_cast %72 : vector<16xf32> to vector<16x1xf32>
    %cst_40 = arith.constant 3.200000e+01 : f32
    %74 = vector.broadcast %cst_40 : f32 to vector<16x1xf32>
    %75 = arith.divf %73, %74 : vector<16x1xf32>
    %76 = vector.broadcast %75 : vector<16x1xf32> to vector<16x32xf32>
    %77 = arith.subf %67, %76 : vector<16x32xf32>
    %78 = arith.mulf %77, %77 : vector<16x32xf32>
    %cst_41 = arith.constant dense<0.000000e+00> : vector<16xf32>
    %79 = vector.multi_reduction <add>, %78, %cst_41 [1] : vector<16x32xf32> to vector<16xf32>
    %80 = vector.shape_cast %79 : vector<16xf32> to vector<16x1xf32>
    %cst_42 = arith.constant 3.200000e+01 : f32
    %81 = vector.broadcast %cst_42 : f32 to vector<16x1xf32>
    %82 = arith.divf %80, %81 : vector<16x1xf32>
    %cst_43 = arith.constant 9.99999974E-6 : f32
    %83 = vector.broadcast %cst_43 : f32 to vector<16x1xf32>
    %84 = arith.addf %82, %83 : vector<16x1xf32>
    %85 = math.rsqrt %84 : vector<16x1xf32>
    %86 = vector.broadcast %75 : vector<16x1xf32> to vector<16x32xf32>
    %87 = arith.subf %67, %86 : vector<16x32xf32>
    %88 = vector.broadcast %85 : vector<16x1xf32> to vector<16x32xf32>
    %89 = arith.mulf %87, %88 : vector<16x32xf32>
    %90 = vector.broadcast %69 : vector<1x32xf32> to vector<16x32xf32>
    %91 = arith.mulf %89, %90 : vector<16x32xf32>
    %92 = vector.broadcast %71 : vector<1x32xf32> to vector<16x32xf32>
    %93 = arith.addf %91, %92 : vector<16x32xf32>
    %94 = arith.addf %93, %3 : vector<16x32xf32>
    %95 = arith.truncf %94 : vector<16x32xf32> to vector<16x32xbf16>
    %c0_44 = arith.constant 0 : index
    %c0_45 = arith.constant 0 : index
    %c0_46 = arith.constant 0 : index
    %96 = vector.load %arg14[%c0_44, %c0_45, %c0_46] : memref<1x32x64xbf16, #tpu.memory_space<vmem>>, vector<1x32x64xbf16>
    %97 = vector.shape_cast %96 : vector<1x32x64xbf16> to vector<32x64xbf16>
    %cst_47 = arith.constant dense<0.000000e+00> : vector<16x64xf32>
    %98 = tpu.matmul %95, %97, %cst_47 {dimension_numbers = #tpu.dot_dimension_numbers<[1], [0], [0], [1], [0, 0, 1, 1], [], []>} : vector<16x32xbf16>, vector<32x64xbf16>, vector<16x64xf32> -> vector<16x64xf32>
    %c0_48 = arith.constant 0 : index
    %c0_49 = arith.constant 0 : index
    %c0_50 = arith.constant 0 : index
    %99 = vector.load %arg15[%c0_48, %c0_49, %c0_50] : memref<1x1x64xf32, #tpu.memory_space<vmem>>, vector<1x1x64xf32>
    %100 = vector.shape_cast %99 : vector<1x1x64xf32> to vector<1x64xf32>
    %101 = vector.broadcast %100 : vector<1x64xf32> to vector<16x64xf32>
    %102 = arith.addf %98, %101 : vector<16x64xf32>
    %cst_51 = arith.constant 0.000000e+00 : f32
    %103 = vector.broadcast %cst_51 : f32 to vector<16x64xf32>
    %104 = arith.maximumf %102, %103 : vector<16x64xf32>
    %105 = arith.truncf %104 : vector<16x64xf32> to vector<16x64xbf16>
    %c0_52 = arith.constant 0 : index
    %c0_53 = arith.constant 0 : index
    %c0_54 = arith.constant 0 : index
    %106 = vector.load %arg16[%c0_52, %c0_53, %c0_54] : memref<1x64x32xbf16, #tpu.memory_space<vmem>>, vector<1x64x32xbf16>
    %107 = vector.shape_cast %106 : vector<1x64x32xbf16> to vector<64x32xbf16>
    %cst_55 = arith.constant dense<0.000000e+00> : vector<16x32xf32>
    %108 = tpu.matmul %105, %107, %cst_55 {dimension_numbers = #tpu.dot_dimension_numbers<[1], [0], [0], [1], [0, 0, 1, 1], [], []>} : vector<16x64xbf16>, vector<64x32xbf16>, vector<16x32xf32> -> vector<16x32xf32>
    %c0_56 = arith.constant 0 : index
    %c0_57 = arith.constant 0 : index
    %c0_58 = arith.constant 0 : index
    %109 = vector.load %arg17[%c0_56, %c0_57, %c0_58] : memref<1x1x32xf32, #tpu.memory_space<vmem>>, vector<1x1x32xf32>
    %110 = vector.shape_cast %109 : vector<1x1x32xf32> to vector<1x32xf32>
    %111 = vector.broadcast %110 : vector<1x32xf32> to vector<16x32xf32>
    %112 = arith.addf %108, %111 : vector<16x32xf32>
    %113 = arith.addf %112, %94 : vector<16x32xf32>
    %c0_59 = arith.constant 0 : index
    %c0_60 = arith.constant 0 : index
    %c0_61 = arith.constant 0 : index
    %114 = vector.load %arg12[%c0_59, %c0_60, %c0_61] : memref<1x1x32xf32, #tpu.memory_space<vmem>>, vector<1x1x32xf32>
    %115 = vector.shape_cast %114 : vector<1x1x32xf32> to vector<1x32xf32>
    %c0_62 = arith.constant 0 : index
    %c0_63 = arith.constant 0 : index
    %c0_64 = arith.constant 0 : index
    %116 = vector.load %arg13[%c0_62, %c0_63, %c0_64] : memref<1x1x32xf32, #tpu.memory_space<vmem>>, vector<1x1x32xf32>
    %117 = vector.shape_cast %116 : vector<1x1x32xf32> to vector<1x32xf32>
    %cst_65 = arith.constant dense<0.000000e+00> : vector<16xf32>
    %118 = vector.multi_reduction <add>, %113, %cst_65 [1] : vector<16x32xf32> to vector<16xf32>
    %119 = vector.shape_cast %118 : vector<16xf32> to vector<16x1xf32>
    %cst_66 = arith.constant 3.200000e+01 : f32
    %120 = vector.broadcast %cst_66 : f32 to vector<16x1xf32>
    %121 = arith.divf %119, %120 : vector<16x1xf32>
    %122 = vector.broadcast %121 : vector<16x1xf32> to vector<16x32xf32>
    %123 = arith.subf %113, %122 : vector<16x32xf32>
    %124 = arith.mulf %123, %123 : vector<16x32xf32>
    %cst_67 = arith.constant dense<0.000000e+00> : vector<16xf32>
    %125 = vector.multi_reduction <add>, %124, %cst_67 [1] : vector<16x32xf32> to vector<16xf32>
    %126 = vector.shape_cast %125 : vector<16xf32> to vector<16x1xf32>
    %cst_68 = arith.constant 3.200000e+01 : f32
    %127 = vector.broadcast %cst_68 : f32 to vector<16x1xf32>
    %128 = arith.divf %126, %127 : vector<16x1xf32>
    %cst_69 = arith.constant 9.99999974E-6 : f32
    %129 = vector.broadcast %cst_69 : f32 to vector<16x1xf32>
    %130 = arith.addf %128, %129 : vector<16x1xf32>
    %131 = math.rsqrt %130 : vector<16x1xf32>
    %132 = vector.broadcast %121 : vector<16x1xf32> to vector<16x32xf32>
    %133 = arith.subf %113, %132 : vector<16x32xf32>
    %134 = vector.broadcast %131 : vector<16x1xf32> to vector<16x32xf32>
    %135 = arith.mulf %133, %134 : vector<16x32xf32>
    %136 = vector.broadcast %115 : vector<1x32xf32> to vector<16x32xf32>
    %137 = arith.mulf %135, %136 : vector<16x32xf32>
    %138 = vector.broadcast %117 : vector<1x32xf32> to vector<16x32xf32>
    %139 = arith.addf %137, %138 : vector<16x32xf32>
    %c0_70 = arith.constant 0 : index
    %c0_71 = arith.constant 0 : index
    %140 = vector.load %arg18[%c0_70, %c0_71] : memref<16x32xf32, #tpu.memory_space<vmem>>, vector<16x32xf32>
    tpu.vector_store %arg18[%c0_70, %c0_71], %139 {strides = array<i32>} : memref<16x32xf32, #tpu.memory_space<vmem>>, vector<16x32xf32>,
    return
  }
  func.func @transform_0(%arg0: i32, %arg1: i32) -> (i32, i32) {
    %c0_i32 = arith.constant 0 : i32
    %c0_i32_0 = arith.constant 0 : i32
    return %arg0, %c0_i32 : i32, i32
  }
  func.func @transform_1(%arg0: i32, %arg1: i32) -> (i32, i32) {
    %c0_i32 = arith.constant 0 : i32
    %c0_i32_0 = arith.constant 0 : i32
    return %arg0, %c0_i32 : i32, i32
  }
  func.func @transform_2(%arg0: i32, %arg1: i32) -> (i32, i32) {
    %c0_i32 = arith.constant 0 : i32
    %c0_i32_0 = arith.constant 0 : i32
    return %arg0, %c0_i32 : i32, i32
  }
  func.func @transform_3(%arg0: i32, %arg1: i32) -> (i32, i32) {
    %c0_i32 = arith.constant 0 : i32
    %c0_i32_0 = arith.constant 0 : i32
    %c0_i32_1 = arith.constant 0 : i32
    return %c0_i32, %c0_i32_0 : i32, i32
  }
  func.func @transform_4(%arg0: i32, %arg1: i32) -> (i32, i32, i32) {
    %c0_i32 = arith.constant 0 : i32
    %c0_i32_0 = arith.constant 0 : i32
    %c0_i32_1 = arith.constant 0 : i32
    return %arg1, %c0_i32, %c0_i32_0 : i32, i32, i32
  }
  func.func @transform_5(%arg0: i32, %arg1: i32) -> (i32, i32, i32) {
    %c0_i32 = arith.constant 0 : i32
    %c0_i32_0 = arith.constant 0 : i32
    %c0_i32_1 = arith.constant 0 : i32
    return %arg1, %c0_i32, %c0_i32_0 : i32, i32, i32
  }
  func.func @transform_6(%arg0: i32, %arg1: i32) -> (i32, i32, i32) {
    %c0_i32 = arith.constant 0 : i32
    %c0_i32_0 = arith.constant 0 : i32
    %c0_i32_1 = arith.constant 0 : i32
    return %arg1, %c0_i32, %c0_i32_0 : i32, i32, i32
  }
  func.func @transform_7(%arg0: i32, %arg1: i32) -> (i32, i32, i32) {
    %c0_i32 = arith.constant 0 : i32
    %c0_i32_0 = arith.constant 0 : i32
    %c0_i32_1 = arith.constant 0 : i32
    return %arg1, %c0_i32, %c0_i32_0 : i32, i32, i32
  }
  func.func @transform_8(%arg0: i32, %arg1: i32) -> (i32, i32, i32) {
    %c0_i32 = arith.constant 0 : i32
    %c0_i32_0 = arith.constant 0 : i32
    %c0_i32_1 = arith.constant 0 : i32
    return %arg1, %c0_i32, %c0_i32_0 : i32, i32, i32
  }
  func.func @transform_9(%arg0: i32, %arg1: i32) -> (i32, i32, i32) {
    %c0_i32 = arith.constant 0 : i32
    %c0_i32_0 = arith.constant 0 : i32
    %c0_i32_1 = arith.constant 0 : i32
    return %arg1, %c0_i32, %c0_i32_0 : i32, i32, i32
  }
  func.func @transform_10(%arg0: i32, %arg1: i32) -> (i32, i32, i32) {
    %c0_i32 = arith.constant 0 : i32
    %c0_i32_0 = arith.constant 0 : i32
    %c0_i32_1 = arith.constant 0 : i32
    return %arg1, %c0_i32, %c0_i32_0 : i32, i32, i32
  }
  func.func @transform_11(%arg0: i32, %arg1: i32) -> (i32, i32, i32) {
    %c0_i32 = arith.constant 0 : i32
    %c0_i32_0 = arith.constant 0 : i32
    %c0_i32_1 = arith.constant 0 : i32
    return %arg1, %c0_i32, %c0_i32_0 : i32, i32, i32
  }
  func.func @transform_12(%arg0: i32, %arg1: i32) -> (i32, i32, i32) {
    %c0_i32 = arith.constant 0 : i32
    %c0_i32_0 = arith.constant 0 : i32
    %c0_i32_1 = arith.constant 0 : i32
    return %arg1, %c0_i32, %c0_i32_0 : i32, i32, i32
  }
  func.func @transform_13(%arg0: i32, %arg1: i32) -> (i32, i32, i32) {
    %c0_i32 = arith.constant 0 : i32
    %c0_i32_0 = arith.constant 0 : i32
    %c0_i32_1 = arith.constant 0 : i32
    return %arg1, %c0_i32, %c0_i32_0 : i32, i32, i32
  }
  func.func @transform_14(%arg0: i32, %arg1: i32) -> (i32, i32, i32) {
    %c0_i32 = arith.constant 0 : i32
    %c0_i32_0 = arith.constant 0 : i32
    %c0_i32_1 = arith.constant 0 : i32
    return %arg1, %c0_i32, %c0_i32_0 : i32, i32, i32
  }
  func.func @transform_15(%arg0: i32, %arg1: i32) -> (i32, i32, i32) {
    %c0_i32 = arith.constant 0 : i32
    %c0_i32_0 = arith.constant 0 : i32
    %c0_i32_1 = arith.constant 0 : i32
    return %arg1, %c0_i32, %c0_i32_0 : i32, i32, i32
  }
  func.func @transform_16(%arg0: i32, %arg1: i32) -> (i32, i32) {
    %c0_i32 = arith.constant 0 : i32
    %c0_i32_0 = arith.constant 0 : i32
    return %arg0, %c0_i32 : i32, i32
  }
}

</mosaic_0001>

<bundles_post_ra>
// kernel: tpu_custom_call.1
= control target key start
LH: loop header
LB: loop body
LE: loop exit
PB: predicated region body
PF: predicated region fallthrough
CT: control target
= control target key end

     0   :  { %s3180_s0 = inlined_call_operand.hbm [shape: f32[16,32], index: 0, kind: input, shape index: {}]   ;;  %s3181_s1 = inlined_call_operand.hbm [shape: bf16[16,32], index: 1, kind: input, shape index: {}]   ;;  %s3182_s2 = inlined_call_operand.hbm [shape: bf16[16,32], index: 2, kind: input, shape index: {}]   ;;  %s3183_s3 = inlined_call_operand.hbm [shape: f32[8,8], index: 3, kind: input, shape index: {}]   ;;  %s3184_s4 = inlined_call_operand.vmem [shape: bf16[2,32,32], index: 4, kind: input, shape index: {}]   ;;  %s3185_s5 = inlined_call_operand.vmem [shape: bf16[2,32,32], index: 5, kind: input, shape index: {}]   ;;  %s3186_s6 = inlined_call_operand.vmem [shape: bf16[2,32,32], index: 6, kind: input, shape index: {}]   ;;  %s3187_s7 = inlined_call_operand.hbm [shape: bf16[2,32,32], index: 7, kind: input, shape index: {}]   ;;  %s3188_s8 = inlined_call_operand.vmem [shape: f32[2,1,32], index: 8, kind: input, shape index: {}]   ;;  %s3189_s9 = inlined_call_operand.vmem [shape: f32[2,1,32], index: 9, kind: input, shape index: {}]   ;;  %s3190_s10 = inlined_call_operand.vmem [shape: f32[2,1,32], index: 10, kind: input, shape index: {}]   ;;  %s3191_s11 = inlined_call_operand.vmem [shape: f32[2,1,32], index: 11, kind: input, shape index: {}]   ;;  %s3192_s12 = inlined_call_operand.hbm [shape: bf16[2,32,64], index: 12, kind: input, shape index: {}]   ;;  %s3193_s13 = inlined_call_operand.vmem [shape: f32[2,1,64], index: 13, kind: input, shape index: {}]   ;;  %s3194_s14 = inlined_call_operand.vmem [shape: bf16[2,64,32], index: 14, kind: input, shape index: {}]   ;;  %s3195_s15 = inlined_call_operand.vmem [shape: f32[2,1,32], index: 15, kind: input, shape index: {}]   ;;  %s3196_s16 = inlined_call_operand.hbm [shape: f32[16,32], index: 16, kind: output, shape index: {}]  }
   0x1   :  { %3206 = sst [smem:[#allocation20_spill]] %s3180_s0 }
   0x2   :  { %3207 = sst [smem:[#allocation21_spill]] %s3181_s1 }
   0x3   :  { %3208 = sst [smem:[#allocation22_spill]] %s3187_s7 }
   0x4   :  { %3209 = sst [smem:[#allocation23_spill]] %s3188_s8 }
   0x5   :  { %3210 = sst [smem:[#allocation24_spill]] %s3189_s9 }
   0x6   :  { %3211 = sst [smem:[#allocation25_spill]] %s3190_s10 }
   0x7   :  { %3212 = sst [smem:[#allocation26_spill]] %s3191_s11 }
   0x8   :  { %3213 = sst [smem:[#allocation27_spill]] %s3193_s13 }
   0x9   :  { %3214 = sst [smem:[#allocation28_spill]] %s3195_s15 }
   0xa   :  { %3215 = sst [smem:[#allocation29_spill]] %s3196_s16 }
   0xb   :  { %21 = vsyncpa [#allocation3], 0 }
   0xc   :  { %22 = vsyncpa [#allocation6], 0 }
   0xd   :  { %23 = vsyncpa [#allocation9], 0 }
   0xe   :  { %24 = vsyncpa [#allocation4], 0  ;;  %s2792_s21 = smov 0   ;;  %s2794_s22 = smov 0  }
   0xf   :  { %s2796_s23 = smov 0   ;;  %s2798_s24 = smov 0  }
  0x10   :  { %s2800_s25 = smov 0   ;;  %s2802_s26 = smov 0  }
  0x11 LB: > { %s2821_s27 = sadd.s32 4294967295, %s2688_s26   ;;  %p239_p0 = scmp.ne.s32.totalorder %s2672_s22, %s2668_s21  ;;  %s2688_s26 = sphi %s2802_s26, %s30_s26   ;;  %s2684_s25 = sphi %s2800_s25, %s3249_s25   ;;  %s2680_s24 = sphi %s2798_s24, %s3248_s24   ;;  %s2676_s23 = sphi %s2796_s23, %s3247_s23   ;;  %s2672_s22 = sphi %s2794_s22, %s3246_s22   ;;  %s2668_s21 = sphi %s2792_s21, %s3245_s21  }
  0x12   : > { %p3197_p1 = scmp.eq.s32.totalorder %s2821_s27, 0  ;;  %p2058_p2 = scmp.ge.s32.totalorder %s2688_s26, 1 }
  0x13   : > { %p484_p3 = scmp.lt.s32.totalorder %s2688_s26, 3  ;;  %s2690_s30 = smov [#allocation2]  }
  0x14   : > { %p2829_p4 = por %p3197_p1, %p239_p0  ;;  %s499_s0 = sshll.u32 %s2690_s30, 4  ;;  %s500_s0 = int_to_ptr.vmem [resolvable:$true] %s499_s0 }
  0x15   : > { %p2833_p5 = pnand %p2058_p2, %p484_p3  ;;  %s2691_s18 = smov [#allocation5]  }
  0x16   : > { %s3216_s28 = scalar_select %p2829_p4, 1, 0 }
  0x17   : > { %p2304_p6 = pneg %p2833_p5  ;;  %s515_s19 = sshll.u32 %s2691_s18, 4  ;;  %s516_s19 = int_to_ptr.vmem [resolvable:$true] %s515_s19 }
  0x18   : > { %s2449_s20 = scalar_lea.vmem %s500_s0, 256  ;;  %p2457_p12 = scmp.lt.s32.totalorder %s500_s0, %s500_s0 }
  0x19   : > { %p2841_p7 = pnand %p2304_p6, %p3197_p1  ;;  %p2450_p9 = scmp.ne.s32.totalorder %s500_s0, %s2449_s20 }
  0x1a   : > { %p2458_p13 = scmp.lt.s32.totalorder %s2449_s20, %s2449_s20 }
  0x1b   : > { %p2440_p8 = pneg %p2841_p7 }
  0x1c   : > { %p2459_p0 = por %p2458_p13, %p2457_p12 }
  0x1d   : > { %p2452_p10 = pnand %p2450_p9, %p2440_p8 }
  0x1f   : > { %p2453_p11 = pneg %p2452_p10 }
  0x21   : > { %p2460_p2 = pnand %p2459_p0, %p2453_p11 }
  0x23   : > { %2463 = shalt.err (!%p2460_p2)
}
  0x24   : > { %s2692_s21 = smov 128   ;;  %s2693_s30 = smov 8  }
  0x25   : > { %s3219_s11 = sld [smem:[#allocation20_spill]]  ;;  %s2475_s10 = scalar_lea.vmem %s516_s19, 128 }
  0x26   : > { %p2476_p3 = scmp.ne.s32.totalorder %s516_s19, %s2475_s10  ;;  %p2483_p10 = scmp.lt.s32.totalorder %s516_s19, %s516_s19 }
  0x27   : > { %p2484_p1 = scmp.lt.s32.totalorder %s2475_s10, %s2475_s10 }
  0x28   : > { %p2478_p6 = pnand %p2476_p3, %p2440_p8 }
  0x29   : > { %p2485_p12 = por %p2484_p1, %p2483_p10 }
  0x2a   : > { %p2479_p9 = pneg %p2478_p6 }
  0x2b   : > { %2307 = dma.hbm_to_vmem [thread:$0]  (!%p2841_p7), %s3219_s11, 256, %s500_s0, [#allocation3], %s2692_s21, %s2692_s21, %s2693_s30  }
  0x2c   : > { %p2486_p11 = pnand %p2485_p12, %p2479_p9 }
  0x2e   : > { %2489 = shalt.err (!%p2486_p11)
}
  0x2f   : > { %s3198_s20 = smov 64   ;;  %s3200_s11 = smov 4  }
  0x30   : > { %s3220_s1 = sld [smem:[#allocation21_spill]]  ;;  %s39_s0 = sadd.s32 1, %s2684_s25 }
  0x31   : > { %s226_s21 = sadd.s32 1, %s2676_s23  ;;  %p40_p1 = scmp.ge.s32.totalorder %s39_s0, 2 }
  0x32   : > { %p233_p13 = scmp.ne.s32.totalorder %s2676_s23, %s2672_s22  ;;  %p234_p0 = scmp.eq.s32.totalorder %s2688_s26, 0 }
  0x33   : > { %p2328_p2 = scmp.lt.s32.totalorder %s2688_s26, 2  ;;  %s3251_s0 = smov (%p40_p1, %s39_s0), 0 }
  0x34   : > { %3221 = sst [smem:[#allocation18_spill]] %s3251_s0  ;;  %p235_p3 = por %p234_p0, %p233_p13 }
  0x35   : > { %s580_s30 = sand.u32 1, %s2688_s26   ;;  %s223_s18 = ssub.s32 %s2684_s25, %s3251_s0 }
  0x36   : > { %2310 = dma.hbm_to_vmem [thread:$0]  (!%p2841_p7), %s3220_s1, 128, %s516_s19, [#allocation6], %s3198_s20, %s3198_s20, %s3200_s11  }
  0x37   : > { %p224_p6 = scmp.eq.s32.totalorder %s223_s18, 0  ;;  %s582_s15 = sand.u32 1, %s2676_s23  }
  0x38   : > { %s2878_s13 = sshll.u32 %s582_s15, 4  ;;  %s3203_s19 = sshll.u32 %s2684_s25, 8 }
  0x39   : > { %s2882_s10 = scalar_select %p224_p6, %s2676_s23, %s226_s21  }
  0x3a   : > { %s3223_s7 = sld [smem:[#allocation22_spill]]  ;;  %s584_s1 = scalar_lea.vmem [#allocation10], %s2878_s13 }
  0x3b   : > { %3222 = sst [smem:[#allocation19_spill]] %s2882_s10  ;;  %s591_s9 = sshll.u32 %s584_s1, 4  ;;  %s592_s9 = int_to_ptr.vmem [resolvable:$true] %s591_s9 }
  0x3c   : > { %p2892_p9 = pnand %p2328_p2, %p235_p3  ;;  %s2696_s15 = smov [#allocation7]  }
  0x3d   : > { %s531_s18 = sshll.u32 %s2696_s15, 4  ;;  %s2896_s0 = scalar_lea.sflag [#allocation3], %s580_s30  ;;  %s532_s18 = int_to_ptr.vmem [resolvable:$true] %s531_s18 }
  0x3e   : > { %p3204_p10 = pneg %p2892_p9  ;;  %s2503_s21 = scalar_lea.vmem %s592_s9, 256 }
  0x3f   : > { %p2504_p12 = scmp.ne.s32.totalorder %s592_s9, %s2503_s21  ;;  %s2697_s1 = smov [#allocation10]  }
  0x40   : > { %s590_s11 = scalar_lea.hbm %s3223_s7, %s3203_s19  ;;  %s2508_s20 = sshll.u32 %s2697_s1, 4  ;;  %s2509_s20 = int_to_ptr.vmem [resolvable:$false] %s2508_s20 }
  0x41   : > { %p2506_p11 = pnand %p2504_p12, %p3204_p10  ;;  %s2510_s16 = scalar_lea.vmem %s2509_s20, 512 }
  0x42   : > { %p2511_p13 = scmp.lt.s32.totalorder %s592_s9, %s2509_s20  ;;  %p2512_p0 = scmp.lt.s32.totalorder %s2510_s16, %s2503_s21 }
  0x43   : > { %p2507_p1 = pneg %p2506_p11 }
  0x44   : > { %p2513_p2 = por %p2512_p0, %p2511_p13 }
  0x46   : > { %p2514_p3 = pnand %p2513_p2, %p2507_p1 }
  0x48   : > { %2517 = shalt.err (!%p2514_p3)
}
  0x49   : > { %s3225_s30 = smov 4   ;;  %s3226_s15 = smov 64  }
  0x4a   : > { %2320 = dma.hbm_to_vmem [thread:$0]  (!%p2892_p9), %s590_s11, 256, %s592_s9, %s2896_s0, %s3226_s15, %s3226_s15, %s3225_s30  }
  0x4b   : > { %s2529_s19 = scalar_lea.vmem %s532_s18, 128  ;;  %p2537_p10 = scmp.lt.s32.totalorder %s532_s18, %s532_s18 }
  0x4c   : > { %p2530_p6 = scmp.ne.s32.totalorder %s532_s18, %s2529_s19  ;;  %p2538_p4 = scmp.lt.s32.totalorder %s2529_s19, %s2529_s19 }
  0x4e   : > { %p2532_p12 = pnand %p2530_p6, %p2440_p8  ;;  %p2539_p13 = por %p2538_p4, %p2537_p10 }
  0x50   : > { %p2533_p11 = pneg %p2532_p12 }
  0x52   : > { %p2540_p1 = pnand %p2539_p13, %p2533_p11 }
  0x54   : > { %2543 = shalt.err (!%p2540_p1)
}
  0x55   : > { %2313 = dma.hbm_to_vmem [thread:$0]  (!%p2841_p7), %s3182_s2, 128, %s532_s18, [#allocation6], %s3226_s15, %s3226_s15, %s3225_s30  }
  0x56   : > { %s2698_s9 = smov [#allocation8]   ;;  %s3227_s20 = sshll.u32 %s2684_s25, 8 }
  0x57   : > { %s545_s11 = sshll.u32 %s2698_s9, 4  ;;  %s2925_s7 = scalar_lea.hbm %s3192_s12, %s3227_s20  ;;  %s546_s11 = int_to_ptr.vmem [resolvable:$true] %s545_s11 }
  0x58   : > { %s2555_s10 = scalar_lea.vmem %s546_s11, 128  ;;  %p2563_p2 = scmp.lt.s32.totalorder %s546_s11, %s546_s11 }
  0x59   : > { %p2556_p4 = scmp.ne.s32.totalorder %s546_s11, %s2555_s10  ;;  %p2564_p3 = scmp.lt.s32.totalorder %s2555_s10, %s2555_s10 }
  0x5b   : > { %p2558_p10 = pnand %p2556_p4, %p2440_p8  ;;  %p2565_p6 = por %p2564_p3, %p2563_p2 }
  0x5d   : > { %p2559_p0 = pneg %p2558_p10 }
  0x5f   : > { %p2566_p12 = pnand %p2565_p6, %p2559_p0 }
  0x61   : > { %2569 = shalt.err (!%p2566_p12)
}
  0x62   : > { %2316 = dma.hbm_to_vmem [thread:$0]  (!%p2841_p7), %s3183_s3, 128, %s546_s11, [#allocation9]  }
  0x63   : > { %s629_s1 = scalar_lea.vmem [#allocation11], %s2878_s13  ;;  %p3228_p8 = pneg %p2892_p9 }
  0x64   : > { %s636_s9 = sshll.u32 %s629_s1, 4  ;;  %s2699_s10 = smov [#allocation11]   ;;  %s637_s9 = int_to_ptr.vmem [resolvable:$true] %s636_s9 }
  0x65   : > { %s2583_s20 = scalar_lea.vmem %s637_s9, 256  ;;  %s2588_s16 = sshll.u32 %s2699_s10, 4  ;;  %s2589_s16 = int_to_ptr.vmem [resolvable:$false] %s2588_s16 }
  0x66   : > { %p2584_p11 = scmp.ne.s32.totalorder %s637_s9, %s2583_s20  ;;  %s2590_s19 = scalar_lea.vmem %s2589_s16, 512 }
  0x67   : > { %p2591_p4 = scmp.lt.s32.totalorder %s637_s9, %s2589_s16  ;;  %p2592_p10 = scmp.lt.s32.totalorder %s2590_s19, %s2583_s20 }
  0x68   : > { %p2586_p13 = pnand %p2584_p11, %p3228_p8 }
  0x69   : > { %p2593_p0 = por %p2592_p10, %p2591_p4 }
  0x6a   : > { %p2587_p1 = pneg %p2586_p13 }
  0x6c   : > { %p2594_p2 = pnand %p2593_p0, %p2587_p1 }
  0x6e   : > { %2597 = shalt.err (!%p2594_p2)
}
  0x6f   : > { %2323 = dma.hbm_to_vmem [thread:$0]  (!%p2892_p9), %s2925_s7, 256, %s637_s9, %s2896_s0, %s3226_s15, %s3226_s15, %s3225_s30  }
  0x70   : > { %668 = sbr.rel (%p2833_p5) target bundleno = 2923 (0xb6b), region = 84  ;;  %p3229_p7 = scmp.eq.s32.totalorder (!%p2833_p5), %s2821_s27, 0 }
  0x75   : > { %2647 = dma.done.wait (%p3229_p7), [#allocation3], 256   ;;  %p3230_p3 = pmov %p3229_p7 }
  0x77   : > { %2649 = vsyncadd (%p3230_p3), [#allocation3], 4294967040  ;;  %p3231_p6 = pmov %p3230_p3 }
  0x78   : > { %p3232_p12 = pmov %p3230_p3 }
  0x79   : > { %2651 = dma.done.wait (%p3231_p6), [#allocation6], 256  }
  0x7a   : > { %2653 = vsyncadd (%p3232_p12), [#allocation6], 4294967040  ;;  %p3233_p11 = pmov %p3230_p3 }
  0x7b   : > { %p3234_p9 = pmov %p3230_p3 }
  0x7c   : > { %2655 = dma.done.wait (%p3233_p11), [#allocation9], 128  }
  0x7d   : > { %2657 = vsyncadd (%p3234_p9), [#allocation9], 4294967168  ;;  %s686_s7 = sand.u32 1, %s2821_s27   ;;  %s688_s8 = sand.u32 1, %s2672_s22  }
  0x7e   : > { %s2962_s13 = sshll.u32 %s688_s8, 4  ;;  %s687_s29 = scalar_lea.sflag [#allocation3], %s686_s7 }
  0x7f   : > { %s690_s17 = scalar_lea.vmem [#allocation10], %s2962_s13  ;;  %p3235_p5 = scmp.ne.s32.totalorder %s3216_s28, 0 }
  0x81   : > { %2659 = dma.done.wait (%p3235_p5), %s687_s29, 512  }
  0x82   : > { %2661 = vsyncadd (%p3235_p5), %s687_s29, 4294966784  ;;  %p789_p8 = scmp.lt.s32.totalorder %s2680_s24, 1  ;;  %p829_p13 = scmp.eq.s32.totalorder %s2680_s24, 0  ;;  %v2700_v0 = vmov 0.0   ;;  %vm2701_vm0 = vmmov 0   ;;  %v2402_v6 = vld [vmem:[#allocation5] sm:$0xff]  }
  0x83   : > { %2188 = vmatprep.subr.bf16.mxu1 %v2700_v0  ;;  %2180 = vmatprep.subr.bf16.mxu0 %v2700_v0  ;;  %v830_v7 = vld [vmem:[#allocation2] sm:$0xff]  ;;  %v831_v8 = vld [vmem:[#allocation2 + $0x8] sm:$0xff]  ;;  %vm872_vm2 = vcmask 261120   ;;  %v833_v10 = vld [vmem:[#allocation12 + $0x8] sm:$0xff]  ;;  %vm1060_vm3 = vcmask 130048   ;;  %s2702_s16 = smov 112  }
  0x84   : > { %s3253_s24 = smov (!%p789_p8, %s2680_s24), 1  ;;  %2192 = vmatprep.mubr.msk.bf16.mxu1 %vm2701_vm0, %v2700_v0  ;;  %2184 = vmatprep.mubr.msk.bf16.mxu0 %vm2701_vm0, %v2700_v0  ;;  %v832_v9 = vld [vmem:[#allocation12] sm:$0xff]  ;;  %v2405_v16 = vld [vmem:[#allocation7] sm:$0xff]   ;;  %vm1181_vm4 = vcmask 1043456   ;;  %v3032_v41 = vld [vmem:[#allocation8] sm:$0xff]  ;;  %vm1153_vm5 = vcmask 64512  }
  0x85   : > { %s834_s28 = scalar_select %p829_p13, 1, 0  ;;  %vm1725_vm6 = vcmask 523264  }
  0x86   : > { %s2134_s0 = sshll.u32 %s3253_s24, 4  ;;  %s2703_s19 = smov 16  }
  0x87   : > { %s798_s11 = scalar_lea.vmem %s3185_s5, %s2134_s0  ;;  %s793_s1 = scalar_lea.vmem %s3184_s4, %s2134_s0  ;;  %v835_v2 = vstv %s834_s28 }
  0x88   : > { %v2398_v1 = vld [vmem:[%s798_s11 + $0x8] sm:$0xff]   ;;  %v2400_v4 = vld [vmem:[%s798_s11] sm:$0xff]   ;;  %vm836_vm1 = vcmp.eq.s32.totalorder %v835_v2, 1  ;;  %s803_s10 = scalar_lea.vmem %s3186_s6, %s2134_s0  ;;  %s699_s7 = scalar_lea.vmem [#allocation11], %s2962_s13 }
  0x89   : > { %v2399_v3 = vld [vmem:[%s793_s1 + $0x8] sm:$0xff]   ;;  %2189 = vmatpush3.bf16.msra.mxu1 %v2398_v1  ;;  %v2401_v5 = vld [vmem:[%s793_s1] sm:$0xff]   ;;  %v2992_v11 = vsel %vm836_vm1, %v830_v7, %v832_v9  ;;  %v2994_v12 = vsel %vm836_vm1, %v831_v8, %v833_v10  ;;  %s2137_s8 = sshll.u32 %s3253_s24, 5  ;;  %s3236_s30 = sld [smem:[#allocation23_spill]] }
  0x8a   : > { %2181 = vmatpush3.bf16.msra.mxu0 %v2399_v3  ;;  %2190 = vmatprep.subr.bf16.mxu1 %v2700_v0  ;;  %v2403_v13 = vld [vmem:[%s803_s10 + $0x8] sm:$0xff]   ;;  %v839_v14 = vpack.c.bf16 %v2994_v12, %v2992_v11  ;;  %v2404_v15 = vld [vmem:[%s803_s10] sm:$0xff]   ;;  %s3108_s28 = scalar_lea.vmem %s3194_s14, %s2137_s8  ;;  %s3237_s21 = sld [smem:[#allocation24_spill]] }
  0x8b   : > { %2182 = vmatprep.subr.bf16.mxu0 %v2700_v0  ;;  %s3238_s10 = sld [smem:[#allocation27_spill]]  ;;  %p2333_p1 = scmp.eq.s32.totalorder %s2821_s27, 1 }
  0x8c   : > { %s3239_s8 = sld [smem:[#allocation28_spill]] }
  0x8d   : > { %2191 = vmatpush3.bf16.msra.mxu1 %v2400_v4  ;;  %s3240_s13 = sld [smem:[#allocation25_spill]] }
  0x8e   : > { %2183 = vmatpush3.bf16.msra.mxu0 %v2401_v5  ;;  %2204 = vmatprep.subr.bf16.mxu1 %v2700_v0  ;;  %s3241_s11 = sld [smem:[#allocation26_spill]] }
  0x8f   : > { %2196 = vmatprep.subr.bf16.mxu0 %v2700_v0  ;;  %s806_s15 = scalar_lea.vmem %s3236_s30, %s3253_s24 }
  0x90   : > { %2193 = vmatmul.mubr.msk.bf16.vlgmr.msra.gmra.mxu1 %vm872_vm2, %v2402_v6  ;;  %s809_s1 = scalar_lea.vmem %s3237_s21, %s3253_s24  ;;  %s2704_s21 = smov [#allocation12]  }
  0x91   : > { %2185 = vmatmul.mubr.msk.bf16.vlgmr.msra.gmra.mxu0 %vm872_vm2, %v839_v14  ;;  %2206 = vmatprep.mubr.msk.bf16.mxu1 %vm2701_vm0, %v2700_v0 }
  0x92   : > { %2197 = vmatpush3.bf16.msra.mxu0 %v2403_v13  ;;  %2200 = vmatprep.mubr.msk.bf16.mxu0 %vm2701_vm0, %v2700_v0  ;;  %s826_s29 = scalar_lea.vmem %s3239_s8, %s3253_s24 }
  0x93   : > { %2198 = vmatprep.subr.bf16.mxu0 %v2700_v0  ;;  %s812_s0 = scalar_lea.vmem %s3240_s13, %s3253_s24 }
  0x94   : > { %s815_s18 = scalar_lea.vmem %s3241_s11, %s3253_s24 }
  0x96   : > { %2199 = vmatpush3.bf16.msra.mxu0 %v2404_v15 }
  0x97   : > { %2210 = vmatprep.subr.bf16.mxu0 %v2700_v0 }
  0x99   : > { %2201 = vmatmul.mubr.msk.bf16.vlgmr.msra.gmra.mxu0 %vm872_vm2, %v2405_v16 }
  0x9a   : > { %2212 = vmatprep.mubr.msk.bf16.mxu0 %vm2701_vm0, %v2700_v0 }
 0x150   : > { %v974_v17 = vpop.f32.mrf.mxu1 }
 0x151   : > { %v2140_v18 = vpack.c.bf16 %v974_v17, %v974_v17  ;;  %v910_v19 = vpop.f32.mrf.mxu0 }
 0x152   : > { %v2194_v20 = vpop.f32.mrf.mxu1  ;;  %v917_v22 = vmul.f32 0.25, %v910_v19 }
 0x153   : > { %v1065_v21 = vsel %vm1060_vm3, %v2140_v18, 0  ;;  %v2186_v23 = vpop.f32.mrf.mxu0 }
 0x154   : > { %v977_v24 = vpop.f32.mrf.mxu1  ;;  %2205 = vmatpush3.bf16.xpose.msra.mxu1 %v1065_v21  ;;  %v2138_v28 = vpack.c.bf16 %v917_v22, %v917_v22 }
 0x155   : > { %v2141_v25 = vpack.c.bf16 %v977_v24, %v977_v24  ;;  %v913_v26 = vpop.f32.mrf.mxu0  ;;  %2216 = vmatprep.subr.bf16.mxu1 %v2700_v0 }
 0x156   : > { %v2195_v27 = vpop.f32.mrf.mxu1  ;;  %v918_v31 = vmul.f32 0.25, %v913_v26 }
 0x157   : > { %v1111_v29 = vsel %vm1060_vm3, %v2141_v25, 0  ;;  %1325 = vrot.lane.b32.xlu1 %v2141_v25, %s2702_s16  ;;  %v2187_v30 = vpop.f32.mrf.mxu0 }
 0x158   : > { %2211 = vmatpush3.bf16.xpose.msra.mxu0 %v1111_v29  ;;  %v2139_v32 = vpack.c.bf16 %v918_v31, %v918_v31 }
 0x159   : > { %2222 = vmatprep.subr.bf16.mxu0 %v2700_v0  ;;  %v1036_v33 = vpop.f32.mrf.mxu0 }
 0x15a   : > { %v3022_v34 = vpack.c.bf16 %v1036_v33, %v1036_v33 }
 0x15b   : > { %2207 = vmatmul.mubr.msk.bf16.vlgmr.msra.gmra.mxu1 %vm1060_vm3, %v2138_v28  ;;  %v2202_v35 = vpop.f32.mrf.mxu0 }
 0x15c   : > { %2218 = vmatprep.mubr.msk.bf16.mxu1 %vm2701_vm0, %v2700_v0  ;;  %v1183_v36 = vsel %vm1181_vm4, %v3022_v34, 0 }
 0x15d   : > { %v1039_v37 = vpop.f32.mrf.mxu0  ;;  %2217 = vmatpush3.bf16.msra.mxu1 %v1183_v36 }
 0x15e   : > { %v3026_v38 = vpack.c.bf16 %v1039_v37, %v1039_v37  ;;  %2228 = vmatprep.subr.bf16.mxu1 %v2700_v0 }
 0x15f   : > { %2213 = vmatmul.mubr.msk.bf16.vlgmr.msra.gmra.mxu0 %vm1060_vm3, %v2139_v32  ;;  %v2203_v39 = vpop.f32.mrf.mxu0 }
 0x160   : > { %2224 = vmatprep.mubr.msk.bf16.mxu0 %vm2701_vm0, %v2700_v0  ;;  %v1229_v40 = vsel %vm1181_vm4, %v3026_v38, 0 }
 0x161   : > { %2223 = vmatpush3.bf16.msra.mxu0 %v1229_v40 }
 0x162   : > { %2234 = vmatprep.subr.bf16.mxu0 %v2700_v0 }
 0x1c9   : > { %v1326_v1 = vpop.permute.xlu1 %1325 }
 0x1ca   : > { %v1331_v14 = vsel %vm1060_vm3, %v1326_v1, 0 }
 0x21b   : > { %v1101_v42 = vpop.f32.mrf.mxu1 }
 0x21c   : > { %v1102_v43 = vadd.f32 %v1101_v42, %v3032_v41 }
 0x21d   : > { %v2208_v44 = vpop.f32.mrf.mxu1 }
 0x21e   : > { %v1154_v45 = vsel %vm1153_vm5, %v1102_v43, -inf }
 0x21f   : > { %1155 = vmax.xlane.f32.xlu0 %v1154_v45  ;;  %v1104_v46 = vpop.f32.mrf.mxu1  ;;  %v1147_v47 = vpop.f32.mrf.mxu0 }
 0x220   : > { %v1148_v48 = vadd.f32 %v1147_v47, %v3032_v41 }
 0x221   : > { %v2209_v49 = vpop.f32.mrf.mxu1  ;;  %v2214_v50 = vpop.f32.mrf.mxu0 }
 0x222   : > { %v1157_v51 = vsel %vm1153_vm5, %v1148_v48, -inf }
 0x223   : > { %1158 = vmax.xlane.f32.xlu0 %v1157_v51  ;;  %v1150_v52 = vpop.f32.mrf.mxu0 }
 0x225   : > { %v2215_v53 = vpop.f32.mrf.mxu0 }
 0x239   : > { %1275 = vrot.lane.b32.xlu0 %v2140_v18, %s2702_s16 }
 0x2a8   : > { %v1156_v54 = vpop.xlane.xlu0 %1155 }
 0x2a9   : > { %v1160_v55 = vsub.f32 %v1102_v43, %v1156_v54 }
 0x2ab   : > { %v1162_v56 = vmul.f32 1.442695, %v1160_v55 }
 0x2ac   : > { %v1159_v57 = vpop.xlane.xlu0 %1158 }
 0x2ad   : > { %2414 = vpow2.f32 %v1162_v56  ;;  %v1161_v58 = vsub.f32 %v1148_v48, %v1159_v57 }
 0x2af   : > { %v1164_v59 = vmul.f32 1.442695, %v1161_v58 }
 0x2b0   : > { %v1276_v6 = vpop.permute.xlu0 %1275 }
 0x2b1   : > { %2416 = vpow2.f32 %v1164_v59  ;;  %v1281_v9 = vsel %vm1060_vm3, %v1276_v6, 0  ;;  %v2406_v59 = vld [vmem:[%s690_s17 + $0x8] sm:$0xff]  }
 0x2ba   : > { %v2415_v60 = vpop.eup %2414 }
 0x2bb   : > { %v1166_v61 = vsel %vm1153_vm5, %v2415_v60, 0.0 }
 0x2bc   : > { %1167 = vadd.xlane.f32.xlu1 %v1166_v61 }
 0x2be   : > { %v2417_v62 = vpop.eup %2416 }
 0x2bf   : > { %v1169_v63 = vsel %vm1153_vm5, %v2417_v62, 0.0 }
 0x2c0   : > { %1170 = vadd.xlane.f32.xlu1 %v1169_v63 }
 0x2d1   : > { %1273 = vrot.lane.b32.xlu1 %v2138_v28, %s2702_s16 }
 0x2d5   : > { %1323 = vrot.lane.b32.xlu1 %v2139_v32, %s2702_s16 }
 0x345   : > { %v1168_v2 = vpop.xlane.xlu1 %1167 }
 0x346   : > { %2418 = vrcp.f32 %v1168_v2 }
 0x349   : > { %v1171_v3 = vpop.xlane.xlu1 %1170 }
 0x34a   : > { %2420 = vrcp.f32 %v1171_v3 }
 0x34d   : > { %v1274_v15 = vpop.permute.xlu1 %1273 }
 0x351   : > { %v1324_v16 = vpop.permute.xlu1 %1323 }
 0x353   : > { %v2419_v4 = vpop.eup %2418 }
 0x354   : > { %v1174_v5 = vmul.f32 %v2419_v4, %v2415_v60  ;;  %v2407_v60 = vld [vmem:[%s690_s17] sm:$0xff]  }
 0x356   : > { %v1176_v7 = vpack.c.bf16 %v1174_v5, %v1174_v5 }
 0x357   : > { %v2421_v8 = vpop.eup %2420 }
 0x358   : > { %2219 = vmatmul.mubr.msk.bf16.vlgmr.msra.gmra.mxu1 %vm1153_vm5, %v1176_v7  ;;  %v1175_v10 = vmul.f32 %v2421_v8, %v2417_v62 }
 0x359   : > { %2229 = vmatpush3.bf16.xpose.msra.mxu1 %v1281_v9  ;;  %2230 = vmatprep.mubr.msk.bf16.mxu1 %vm2701_vm0, %v2700_v0 }
 0x35a   : > { %v1177_v13 = vpack.c.bf16 %v1175_v10, %v1175_v10  ;;  %2240 = vmatprep.subr.bf16.mxu1 %v2700_v0 }
 0x35c   : > { %2225 = vmatmul.mubr.msk.bf16.vlgmr.msra.gmra.mxu0 %vm1153_vm5, %v1177_v13 }
 0x35d   : > { %2235 = vmatpush3.bf16.xpose.msra.mxu0 %v1331_v14  ;;  %2236 = vmatprep.mubr.msk.bf16.mxu0 %vm2701_vm0, %v2700_v0 }
 0x35e   : > { %2246 = vmatprep.subr.bf16.mxu0 %v2700_v0 }
 0x360   : > { %2231 = vmatmul.mubr.msk.bf16.vlgmr.msra.gmra.mxu1 %vm1060_vm3, %v1274_v15 }
 0x361   : > { %2242 = vmatprep.mubr.msk.bf16.mxu1 %vm2701_vm0, %v2700_v0 }
 0x364   : > { %2237 = vmatmul.mubr.msk.bf16.vlgmr.msra.gmra.mxu0 %vm1060_vm3, %v1324_v16 }
 0x365   : > { %2248 = vmatprep.mubr.msk.bf16.mxu0 %vm2701_vm0, %v2700_v0 }
 0x418   : > { %v3059_v17 = vpop.f32.mrf.mxu1 }
 0x419   : > { %v1271_v9 = vpack.c.bf16 %v3059_v17, %v3059_v17 }
 0x41a   : > { %v2220_v18 = vpop.f32.mrf.mxu1 }
 0x41c   : > { %v1222_v19 = vpop.f32.mrf.mxu1  ;;  %v3061_v20 = vpop.f32.mrf.mxu0 }
 0x41d   : > { %v1272_v10 = vpack.c.bf16 %v3061_v20, %v3061_v20 }
 0x41e   : > { %v2221_v21 = vpop.f32.mrf.mxu1  ;;  %v2226_v22 = vpop.f32.mrf.mxu0 }
 0x420   : > { %v1268_v23 = vpop.f32.mrf.mxu0  ;;  %v1317_v24 = vpop.f32.mrf.mxu1 }
 0x421   : > { %v1318_v25 = vadd.f32 %v1317_v24, %v3032_v41 }
 0x422   : > { %v2227_v26 = vpop.f32.mrf.mxu0  ;;  %v2232_v27 = vpop.f32.mrf.mxu1 }
 0x423   : > { %v1373_v28 = vsel %vm1153_vm5, %v1318_v25, -inf }
 0x424   : > { %1374 = vmax.xlane.f32.xlu0 %v1373_v28  ;;  %v1320_v29 = vpop.f32.mrf.mxu1  ;;  %v1367_v30 = vpop.f32.mrf.mxu0 }
 0x425   : > { %v1368_v31 = vadd.f32 %v1367_v30, %v3032_v41 }
 0x426   : > { %v2233_v32 = vpop.f32.mrf.mxu1  ;;  %v2238_v33 = vpop.f32.mrf.mxu0 }
 0x427   : > { %v1376_v35 = vsel %vm1153_vm5, %v1368_v31, -inf  ;;  %v2408_v33 = vld [vmem:[%s699_s7 + $0x8] sm:$0xff]  }
 0x428   : > { %1377 = vmax.xlane.f32.xlu1 %v1376_v35  ;;  %v1370_v36 = vpop.f32.mrf.mxu0  ;;  %v2409_v35 = vld [vmem:[%s699_s7] sm:$0xff]  }
 0x429   : > { %v2410_v36 = vld [vmem:[%s3108_s28 + $0x18] sm:$0xff]  }
 0x42a   : > { %v2239_v37 = vpop.f32.mrf.mxu0 }
 0x439   : > { %1445 = vrot.lane.b32.xlu1 %v3026_v38, %s2702_s16 }
 0x4ad   : > { %v1375_v39 = vpop.xlane.xlu0 %1374 }
 0x4ae   : > { %v1379_v40 = vsub.f32 %v1318_v25, %v1375_v39 }
 0x4b0   : > { %v1381_v42 = vmul.f32 1.442695, %v1379_v40 }
 0x4b1   : > { %v1378_v43 = vpop.xlane.xlu1 %1377 }
 0x4b2   : > { %2422 = vpow2.f32 %v1381_v42  ;;  %v1380_v44 = vsub.f32 %v1368_v31, %v1378_v43 }
 0x4b4   : > { %v1383_v45 = vmul.f32 1.442695, %v1380_v44 }
 0x4b5   : > { %v1446_v46 = vpop.permute.xlu1 %1445 }
 0x4b6   : > { %2424 = vpow2.f32 %v1383_v45  ;;  %v1451_v41 = vsel %vm1181_vm4, %v1446_v46, 0  ;;  %v2114_v46 = vld [vmem:[%s806_s15] ss:$0 sm:$0xff] }
 0x4b7   : > { %2247 = vmatpush3.bf16.msra.mxu0 %v1451_v41 }
 0x4b8   : > { %2260 = vmatprep.subr.bf16.mxu0 %v2700_v0 }
 0x4bf   : > { %v2423_v47 = vpop.eup %2422 }
 0x4c0   : > { %v1385_v48 = vsel %vm1153_vm5, %v2423_v47, 0.0 }
 0x4c1   : > { %1386 = vadd.xlane.f32.xlu0 %v1385_v48 }
 0x4c3   : > { %v2425_v49 = vpop.eup %2424 }
 0x4c4   : > { %v1388_v38 = vsel %vm1153_vm5, %v2425_v49, 0.0 }
 0x4c5   : > { %1389 = vadd.xlane.f32.xlu0 %v1388_v38 }
 0x4db   : > { %1397 = vrot.lane.b32.xlu0 %v3022_v34, %s2702_s16  ;;  %s818_s16 = scalar_lea.vmem %s3238_s10, %s3253_s24 }
 0x54a   : > { %v1387_v50 = vpop.xlane.xlu0 %1386 }
 0x54b   : > { %2426 = vrcp.f32 %v1387_v50 }
 0x54e   : > { %v1390_v51 = vpop.xlane.xlu0 %1389 }
 0x54f   : > { %2428 = vrcp.f32 %v1390_v51 }
 0x552   : > { %v1398_v52 = vpop.permute.xlu0 %1397 }
 0x553   : > { %v1403_v53 = vsel %vm1181_vm4, %v1398_v52, 0 }
 0x554   : > { %2241 = vmatpush3.bf16.msra.mxu1 %v1403_v53 }
 0x555   : > { %2252 = vmatprep.subr.bf16.mxu1 %v2700_v0 }
 0x558   : > { %v2427_v54 = vpop.eup %2426 }
 0x559   : > { %v1393_v55 = vmul.f32 %v2427_v54, %v2423_v47 }
 0x55b   : > { %v1395_v56 = vpack.c.bf16 %v1393_v55, %v1393_v55 }
 0x55c   : > { %v2429_v57 = vpop.eup %2428 }
 0x55d   : > { %2243 = vmatmul.mubr.msk.bf16.vlgmr.msra.gmra.mxu1 %vm1153_vm5, %v1395_v56  ;;  %v1394_v58 = vmul.f32 %v2429_v57, %v2425_v49  ;;  %v2115_v49 = vld [vmem:[%s809_s1] ss:$0 sm:$0xff]  ;;  %v2411_v56 = vld [vmem:[%s3108_s28 + $0x10] sm:$0xff]   ;;  %v2412_v57 = vld [vmem:[%s3108_s28 + $0x8] sm:$0xff]   ;;  %s1827_s1 = sshll.u32 %s2704_s21, 4  ;;  %s1828_s1 = int_to_ptr.vmem [resolvable:$true] %s1827_s1 }
 0x55e   : > { %2256 = vmatprep.mubr.msk.bf16.mxu1 %vm2701_vm0, %v2700_v0  ;;  %2253 = vmatpush3.bf16.msra.mxu1 %v2406_v59  ;;  %s2598_s24 = scalar_lea.vmem %s1828_s1, 256  ;;  %p2605_p2 = scmp.lt.s32.totalorder %s1828_s1, %s1828_s1 }
 0x55f   : > { %v1396_v34 = vpack.c.bf16 %v1394_v58, %v1394_v58  ;;  %2254 = vmatprep.subr.bf16.mxu1 %v2700_v0  ;;  %v2413_v58 = vld [vmem:[%s3108_s28] sm:$0xff]   ;;  %p2599_p4 = scmp.ne.s32.totalorder %s1828_s1, %s2598_s24  ;;  %p2606_p7 = scmp.lt.s32.totalorder %s2598_s24, %s2598_s24 }
 0x561   : > { %2249 = vmatmul.mubr.msk.bf16.vlgmr.msra.gmra.mxu0 %vm1153_vm5, %v1396_v34  ;;  %p2600_p10 = pnand %p2599_p4, %p2333_p1  ;;  %p2607_p3 = por %p2606_p7, %p2605_p2 }
 0x562   : > { %2264 = vmatprep.mubr.msk.bf16.mxu0 %vm2701_vm0, %v2700_v0  ;;  %2255 = vmatpush3.bf16.msra.mxu1 %v2407_v60 }
 0x563   : > { %2268 = vmatprep.subr.bf16.mxu1 %v2700_v0  ;;  %2261 = vmatpush3.bf16.msra.mxu0 %v2408_v33  ;;  %p2601_p0 = pneg %p2600_p10 }
 0x564   : > { %2262 = vmatprep.subr.bf16.mxu0 %v2700_v0 }
 0x565   : > { %p2608_p6 = pnand %p2607_p3, %p2601_p0 }
 0x567   : > { %2263 = vmatpush3.bf16.msra.mxu0 %v2409_v35  ;;  %v2127_v35 = vld [vmem:[%s815_s18] ss:$0 sm:$0xff] }
 0x61d   : > { %v1439_v61 = vpop.f32.mrf.mxu1 }
 0x61e   : > { %v1493_v62 = vpack.c.bf16 %v1439_v61, %v1439_v61 }
 0x61f   : > { %v2244_v63 = vpop.f32.mrf.mxu1 }
 0x620   : > { %1497 = vrot.lane.b32.xlu1 %v1493_v62, %s2703_s19 }
 0x621   : > { %v1442_v1 = vpop.f32.mrf.mxu1  ;;  %v1487_v2 = vpop.f32.mrf.mxu0 }
 0x622   : > { %v1494_v3 = vpack.c.bf16 %v1487_v2, %v1487_v2 }
 0x623   : > { %v2245_v4 = vpop.f32.mrf.mxu1  ;;  %v2250_v5 = vpop.f32.mrf.mxu0 }
 0x624   : > { %1499 = vrot.lane.b32.xlu1 %v1494_v3, %s2703_s19 }
 0x625   : > { %v1490_v6 = vpop.f32.mrf.mxu0 }
 0x627   : > { %v2251_v7 = vpop.f32.mrf.mxu0 }
 0x692   : > { %v1498_v8 = vpop.permute.xlu1 %1497 }
 0x693   : > { %v1503_v14 = vsel %vm1060_vm3, %v1271_v9, %v1498_v8 }
 0x696   : > { %v1500_v13 = vpop.permute.xlu1 %1499 }
 0x697   : > { %v1506_v15 = vsel %vm1060_vm3, %v1272_v10, %v1500_v13 }
 0x698   : > { %v2110_v16 = vcombine.low %v1503_v14, %v1506_v15 }
 0x69a   : > { %2257 = vmatmul.mubr.msk.bf16.vlgmr.msra.gmra.mxu1 %vm872_vm2, %v2110_v16 }
 0x69b   : > { %2276 = vmatprep.mubr.msk.bf16.mxu1 %vm2701_vm0, %v2700_v0  ;;  %2269 = vmatpush3.bf16.msra.mxu1 %v2410_v36 }
 0x69c   : > { %2270 = vmatprep.subr.bf16.mxu1 %v2700_v0 }
 0x69f   : > { %2271 = vmatpush3.bf16.msra.mxu1 %v2411_v56 }
 0x6a0   : > { %2272 = vmatprep.subr.bf16.mxu1 %v2700_v0 }
 0x6a3   : > { %2273 = vmatpush3.bf16.msra.mxu1 %v2412_v57 }
 0x6a4   : > { %2274 = vmatprep.subr.bf16.mxu1 %v2700_v0  ;;  %v2120_v0 = vld [vmem:[%s826_s29] ss:$0 sm:$0xff] }
 0x6a7   : > { %2275 = vmatpush3.bf16.msra.mxu1 %v2413_v58 }
 0x75a   : > { %v1561_v18 = vpop.f32.mrf.mxu1 }
 0x75b   : > { %v1570_v19 = vsel %vm872_vm2, %v1561_v18, 0.0 }
 0x75c   : > { %1571 = vadd.xlane.f32.xlu0 %v1570_v19  ;;  %v2258_v21 = vpop.f32.mrf.mxu1 }
 0x75e   : > { %v1564_v17 = vpop.f32.mrf.mxu1 }
 0x75f   : > { %v1573_v20 = vsel %vm872_vm2, %v1564_v17, 0.0 }
 0x760   : > { %1574 = vadd.xlane.f32.xlu1 %v1573_v20  ;;  %v2259_v22 = vpop.f32.mrf.mxu1 }
 0x7e5   : > { %v1572_v23 = vpop.xlane.xlu0 %1571 }
 0x7e6   : > { %v1577_v24 = vmul.f32 0.03125, %v1572_v23 }
 0x7e8   : > { %v1579_v25 = vsub.f32 %v1561_v18, %v1577_v24 }
 0x7e9   : > { %v1575_v26 = vpop.xlane.xlu1 %1574 }
 0x7ea   : > { %v1578_v27 = vmul.f32 0.03125, %v1575_v26  ;;  %v1581_v28 = vmul.f32 %v1579_v25, %v1579_v25 }
 0x7ec   : > { %v1580_v29 = vsub.f32 %v1564_v17, %v1578_v27  ;;  %v1583_v30 = vsel %vm872_vm2, %v1581_v28, 0.0 }
 0x7ed   : > { %1584 = vadd.xlane.f32.xlu0 %v1583_v30 }
 0x7ee   : > { %v1582_v31 = vmul.f32 %v1580_v29, %v1580_v29 }
 0x7f0   : > { %v1586_v32 = vsel %vm872_vm2, %v1582_v31, 0.0 }
 0x7f1   : > { %1587 = vadd.xlane.f32.xlu0 %v1586_v32  ;;  %v2126_v32 = vld [vmem:[%s812_s0] ss:$0 sm:$0xff] }
 0x876   : > { %v1585_v37 = vpop.xlane.xlu0 %1584 }
 0x877   : > { %v1589_v39 = vmul.f32 0.03125, %v1585_v37 }
 0x879   : > { %v1591_v40 = vadd.f32 1e-05, %v1589_v39 }
 0x87a   : > { %v1588_v42 = vpop.xlane.xlu0 %1587 }
 0x87b   : > { %2430 = vrsqrt.f32 %v1591_v40  ;;  %v1590_v43 = vmul.f32 0.03125, %v1588_v42 }
 0x87d   : > { %v1592_v44 = vadd.f32 1e-05, %v1590_v43 }
 0x87f   : > { %2432 = vrsqrt.f32 %v1592_v44 }
 0x888   : > { %v2431_v45 = vpop.eup %2430 }
 0x889   : > { %v1595_v41 = vmul.f32 %v2431_v45, %v1579_v25 }
 0x88b   : > { %v1603_v47 = vmul.f32 %v2114_v46, %v1595_v41 }
 0x88c   : > { %v2433_v48 = vpop.eup %2432 }
 0x88d   : > { %v1596_v38 = vmul.f32 %v2433_v48, %v1580_v29  ;;  %v1611_v51 = vadd.f32 %v2115_v49, %v1603_v47 }
 0x88f   : > { %v1604_v50 = vmul.f32 %v2114_v46, %v1596_v38  ;;  %v1613_v53 = vadd.f32 %v1611_v51, %v2992_v11  ;;  %v2116_v11 = vld [vmem:[%s818_s16] ss:$0 sm:$0xff] }
 0x891   : > { %v1612_v52 = vadd.f32 %v2115_v49, %v1604_v50 }
 0x893   : > { %v1614_v54 = vadd.f32 %v1612_v52, %v2994_v12 }
 0x895   : > { %v1615_v55 = vpack.c.bf16 %v1614_v54, %v1613_v53 }
 0x897   : > { %2265 = vmatmul.mubr.msk.bf16.vlgmr.msra.gmra.mxu0 %vm872_vm2, %v1615_v55 }
 0x957   : > { %v1676_v12 = vpop.f32.mrf.mxu0 }
 0x958   : > { %v1677_v59 = vadd.f32 %v2116_v11, %v1676_v12 }
 0x959   : > { %v2266_v34 = vpop.f32.mrf.mxu0 }
 0x95a   : > { %v1683_v63 = vmax.f32 %v1677_v59, 0.0 }
 0x95b   : > { %v1679_v60 = vpop.f32.mrf.mxu0 }
 0x95c   : > { %v1680_v61 = vadd.f32 %v2116_v11, %v1679_v60 }
 0x95d   : > { %v2267_v62 = vpop.f32.mrf.mxu0 }
 0x95e   : > { %v1684_v1 = vmax.f32 %v1680_v61, 0.0 }
 0x960   : > { %v1685_v2 = vpack.c.bf16 %v1684_v1, %v1683_v63 }
 0x962   : > { %2277 = vmatmul.mubr.msk.bf16.vlgmr.msra.gmra.mxu1 %vm1725_vm6, %v1685_v2 }
 0xa22   : > { %v1763_v3 = vpop.f32.mrf.mxu1 }
 0xa23   : > { %v1764_v4 = vadd.f32 %v2120_v0, %v1763_v3 }
 0xa24   : > { %v2278_v5 = vpop.f32.mrf.mxu1 }
 0xa25   : > { %v1770_v6 = vadd.f32 %v1764_v4, %v1613_v53 }
 0xa26   : > { %v1766_v7 = vpop.f32.mrf.mxu1 }
 0xa27   : > { %v1767_v8 = vadd.f32 %v2120_v0, %v1766_v7  ;;  %v1774_v9 = vsel %vm872_vm2, %v1770_v6, 0.0 }
 0xa28   : > { %1775 = vadd.xlane.f32.xlu0 %v1774_v9  ;;  %v2279_v10 = vpop.f32.mrf.mxu1 }
 0xa29   : > { %v1771_v13 = vadd.f32 %v1767_v8, %v1614_v54 }
 0xa2b   : > { %v1777_v14 = vsel %vm872_vm2, %v1771_v13, 0.0 }
 0xa2c   : > { %1778 = vadd.xlane.f32.xlu1 %v1777_v14 }
 0xab1   : > { %v1776_v15 = vpop.xlane.xlu0 %1775 }
 0xab2   : > { %v1780_v16 = vmul.f32 0.03125, %v1776_v15 }
 0xab4   : > { %v1782_v18 = vsub.f32 %v1770_v6, %v1780_v16 }
 0xab5   : > { %v1779_v19 = vpop.xlane.xlu1 %1778 }
 0xab6   : > { %v1781_v21 = vmul.f32 0.03125, %v1779_v19  ;;  %v1784_v17 = vmul.f32 %v1782_v18, %v1782_v18 }
 0xab8   : > { %v1783_v20 = vsub.f32 %v1771_v13, %v1781_v21  ;;  %v1786_v22 = vsel %vm872_vm2, %v1784_v17, 0.0 }
 0xab9   : > { %1787 = vadd.xlane.f32.xlu0 %v1786_v22 }
 0xaba   : > { %v1785_v23 = vmul.f32 %v1783_v20, %v1783_v20 }
 0xabc   : > { %v1789_v24 = vsel %vm872_vm2, %v1785_v23, 0.0 }
 0xabd   : > { %1790 = vadd.xlane.f32.xlu1 %v1789_v24 }
 0xb42   : > { %v1788_v25 = vpop.xlane.xlu0 %1787 }
 0xb43   : > { %v1792_v26 = vmul.f32 0.03125, %v1788_v25 }
 0xb45   : > { %v1794_v27 = vadd.f32 1e-05, %v1792_v26 }
 0xb46   : > { %v1791_v28 = vpop.xlane.xlu1 %1790 }
 0xb47   : > { %2434 = vrsqrt.f32 %v1794_v27  ;;  %v1793_v29 = vmul.f32 0.03125, %v1791_v28 }
 0xb49   : > { %v1795_v30 = vadd.f32 1e-05, %v1793_v29 }
 0xb4b   : > { %2436 = vrsqrt.f32 %v1795_v30 }
 0xb54   : > { %v2435_v31 = vpop.eup %2434 }
 0xb55   : > { %v1798_v33 = vmul.f32 %v2435_v31, %v1782_v18 }
 0xb57   : > { %v1806_v36 = vmul.f32 %v2126_v32, %v1798_v33 }
 0xb58   : > { %v2437_v37 = vpop.eup %2436 }
 0xb59   : > { %v1814_v39 = vadd.f32 %v2127_v35, %v1806_v36  ;;  %v1799_v40 = vmul.f32 %v2437_v37, %v1783_v20 }
 0xb5b   : > { %1816 = vst.msk [vmem:[#allocation12] sm:$0xff] %vm872_vm2, %v1814_v39  ;;  %v1807_v42 = vmul.f32 %v2126_v32, %v1799_v40 }
 0xb5d   : > { %v1815_v43 = vadd.f32 %v2127_v35, %v1807_v42 }
 0xb5f   : > { %1817 = vst.msk [vmem:[#allocation12 + $0x8] sm:$0xff] %vm872_vm2, %v1815_v43 }
 0xb60   : > { %2611 = shalt.err (!%p2608_p6)
}
 0xb61   : > { %s2705_s9 = smov 128   ;;  %s2706_s20 = smov 8  }
 0xb62   : > { %s3242_s19 = sld [smem:[#allocation29_spill]] }
 0xb68   : > { %2301 = dma.vmem_to_hbm [thread:$0]  (%p2333_p1), %s1828_s1, 256, %s3242_s19, [#allocation4], %s2705_s9, %s2705_s9, %s2706_s20  }
 0xb69   : > { %2663 = dma.done.wait (%p2333_p1), [#allocation4], 256  }
 0xb6a   : > { %2665 = vsyncadd (%p2333_p1), [#allocation4], 4294967040 }
 0xb6b PF: > { %s30_s26 = sadd.s32 1, %s2688_s26   ;;  %s3243_s7 = sld [smem:[#allocation19_spill]] }
 0xb6c   : > { %p27_p12 = scmp.ge.s32.totalorder %s30_s26, 4   ;;  %s3244_s8 = sld [smem:[#allocation18_spill]] }
 0xb6d   : > { %s3245_s21 = smov %s2672_s22  ;;  %s3246_s22 = smov %s2676_s23 }
 0xb6e   : > { %s3248_s24 = smov %s2684_s25  ;;  %29 = sbr.rel (!%p27_p12) target bundleno = 17 (0x11), region = 181 }
 0xb71   : > { %s3247_s23 = smov %s3243_s7 }
 0xb72   : > { %s3249_s25 = smov %s3244_s8 }
 0xb73   :  { %1843 = vsyncpa [#allocation3], 1 }
 0xb74   :  { %1845 = vsyncpa [#allocation3 + $0x1], 1 }
 0xb75   :  { %1846 = vsyncpa [#allocation6], 1 }
 0xb76   :  { %1847 = vsyncpa [#allocation9], 1 }
 0xb77   :  { %1848 = vsyncpa [#allocation4], 1 }
 0xb78   :  { %1850 = vsyncpa [#allocation4 + $0x1], 1 }

</bundles_post_ra>
